<compile_context>
chip_gen: v7x
topology: tpu7x:2x2x1
jax: 0.10.0
libtpu: 0.0.40
codegen_flags: <defaults>
</compile_context>

<pallas_src>
import math
import functools

import jax
import jax.numpy as jnp
from jax import lax
from jax.experimental import pallas as pl
from jax.experimental.pallas import tpu as pltpu


def _attn_kernel(x_ref, w_ref, b_ref, mask_ref, ctx_ref, *, head_size, group_heads):
    # x_ref    : (1, S, H)           — hidden states for batch b
    # w_ref    : (1, H, 3*G*dh)      — fused [Wq | Wk | Wv] for this head group
    # b_ref    : (1, 1, 3*G*dh)      — fused bias
    # mask_ref : (1, 1, 1, S)        — additive attention mask for batch b
    # ctx_ref  : (1, S, G*dh)        — group-g columns of the final [B, S, H]
    dh = head_size
    G = group_heads
    gdh = G * dh

    x = x_ref[0]                       # [S, H]
    w = w_ref[0]                       # [H, 3*G*dh]
    bias = b_ref[0]                    # [1, 3*G*dh]

    # Single fused lane-dense projection: one MXU pass for Q, K and V.
    # f32 accumulation, then down-cast so the attention matmuls run the MXU
    # in the activation dtype (bf16 rate when fed bf16).
    qkv = jnp.dot(x, w, preferred_element_type=jnp.float32) + bias   # [S, 3*G*dh] f32

    scale = 1.0 / math.sqrt(dh)
    # Scale hoisted out of the head loop: S*G*dh multiplies, not G*S^2.
    q = (qkv[:, 0 * gdh:1 * gdh] * scale).astype(x.dtype)            # [S, G*dh]
    k = qkv[:, 1 * gdh:2 * gdh].astype(x.dtype)
    v = qkv[:, 2 * gdh:3 * gdh].astype(x.dtype)

    mask = mask_ref[0, 0]              # [1, S] — broadcast over query rows

    for h in range(G):                 # static, small unrolled head loop
        qh = q[:, h * dh:(h + 1) * dh]
        kh = k[:, h * dh:(h + 1) * dh]
        vh = v[:, h * dh:(h + 1) * dh]

        # Contract on dh directly — no explicit k.T relayout before the MXU.
        s = lax.dot_general(qh, kh,
                            dimension_numbers=(((1,), (1,)), ((), ())),
                            preferred_element_type=jnp.float32)       # [S, S]
        s = s + mask

        # Softmax with deferred normalization: exp (EUP), contract with V,
        # then scale the small [S, dh] result by 1/denom (EUP approx recip).
        m = jnp.max(s, axis=-1, keepdims=True)
        e = jnp.exp(s - m)                                            # [S, S] f32
        denom = jnp.sum(e, axis=-1, keepdims=True)                    # [S, 1]

        o = jnp.dot(e.astype(vh.dtype), vh,
                    preferred_element_type=jnp.float32)               # [S, dh]
        o = o * pl.reciprocal(denom, approx=True)

        # Store each head's slice as it is produced (bounds live ranges — no
        # G-wide concatenate).  The HBM writeback of this output block is
        # still a single lane-dense (1, S, G*dh) DMA.
        ctx_ref[0, :, h * dh:(h + 1) * dh] = o.astype(ctx_ref.dtype)


def _vmem_bytes_estimate(S, H, G, dh, act_bytes):
    # Double-buffered pipeline blocks + in-kernel f32 temporaries.
    x_blk = S * H * act_bytes
    w_blk = H * 3 * G * dh * act_bytes
    b_blk = 3 * G * dh * act_bytes
    m_blk = S * 4
    o_blk = S * G * dh * act_bytes
    blocks = 2 * (x_blk + w_blk + b_blk + m_blk + o_blk)
    temps = S * 3 * G * dh * 4 + 2 * S * S * 4 + S * dh * 4   # qkv + (s, e) + o
    return blocks + temps


def self_attention(hidden_states, attention_mask, params, num_heads,
                   heads_per_step=None):
    """hidden_states: [B, S, H]; attention_mask: [B, 1, 1, S] additive mask."""
    B, S, H = hidden_states.shape
    assert H % num_heads == 0
    dh = H // num_heads

    # Head group size per grid step.  Default: all heads in one step for B>1
    # small configs; halve when B == 1 so both v7x TensorCores get work.
    # For BERT-base shapes (dh=64, H=768) pick ~2 on v5e / 4 on v6e-v7x.
    if heads_per_step is None:
        G = num_heads
        if B == 1 and num_heads % 2 == 0:
            G = num_heads // 2
    else:
        G = heads_per_step
    assert num_heads % G == 0
    NG = num_heads // G

    # torch Linear computes y = x @ W.T + b with W:[out, in]; params hold
    # W_jax = W_torch.T of shape [H, H].  Output columns are head-ordered, so
    # grouping G consecutive heads is a contiguous column slice.
    def group_w(w):   # [H, H] -> [NG, H, G*dh]
        return w.reshape(H, NG, G * dh).transpose(1, 0, 2)

    def group_b(b):   # [H] -> [NG, 1, G*dh]
        return b.reshape(NG, 1, G * dh)

    wq, wk, wv = group_w(params["wq"]), group_w(params["wk"]), group_w(params["wv"])
    bq, bk, bv = group_b(params["bq"]), group_b(params["bk"]), group_b(params["bv"])

    # Fused per-group projection weights: [NG, H, 3*G*dh] = [Wq_g | Wk_g | Wv_g].
    w_fused = jnp.concatenate([wq, wk, wv], axis=-1)
    b_fused = jnp.concatenate([bq, bk, bv], axis=-1)

    kernel = functools.partial(_attn_kernel, head_size=dh, group_heads=G)

    act_bytes = hidden_states.dtype.itemsize
    mask_bytes = attention_mask.dtype.itemsize
    vmem_est = _vmem_bytes_estimate(S, H, G, dh, act_bytes)
    vmem_limit = int(min(max(2 * vmem_est, 16 * 2 ** 20), 64 * 2 ** 20))

    # Advisory cost estimate: fused projection + per-head score & P@V matmuls.
    flops = 2 * B * S * H * (3 * H) + 4 * B * num_heads * S * S * dh
    transcendentals = B * num_heads * S * S
    bytes_accessed = (NG * B * S * H * act_bytes          # x re-read per group
                      + H * 3 * H * act_bytes             # fused weights
                      + 3 * H * act_bytes                 # fused bias
                      + NG * B * S * mask_bytes           # mask re-read per group
                      + B * S * H * act_bytes)            # output
    cost = pl.CostEstimate(flops=flops, transcendentals=transcendentals,
                           bytes_accessed=int(bytes_accessed))

    # Output is produced directly in [B, S, H]: group g owns the contiguous
    # column slice [g*G*dh : (g+1)*G*dh] of H, matching torch's
    # permute(0, 2, 1, 3).view(B, S, all_head_size) layout.
    context_layer = pl.pallas_call(
        kernel,
        out_shape=jax.ShapeDtypeStruct((B, S, H), hidden_states.dtype),
        grid_spec=pltpu.PrefetchScalarGridSpec(
            num_scalar_prefetch=0,
            # Head-group axis outermost: the fused weight block index is
            # constant across the inner batch loop, so each group's weights
            # are DMA'd into VMEM once.  (If B*S*H re-reads outweigh the
            # weight block at your shapes, swap to grid=(B, NG).)
            grid=(NG, B),
            in_specs=[
                pl.BlockSpec((1, S, H), lambda g, b: (b, 0, 0)),            # x
                pl.BlockSpec((1, H, 3 * G * dh), lambda g, b: (g, 0, 0)),   # fused W
                pl.BlockSpec((1, 1, 3 * G * dh), lambda g, b: (g, 0, 0)),   # fused bias
                pl.BlockSpec((1, 1, 1, S), lambda g, b: (b, 0, 0, 0)),      # mask
            ],
            out_specs=pl.BlockSpec((1, S, G * dh), lambda g, b: (b, 0, g)),
        ),
        compiler_params=pltpu.CompilerParams(
            dimension_semantics=("parallel", "parallel"),
            vmem_limit_bytes=vmem_limit),
        cost_estimate=cost,
    )(hidden_states, w_fused, b_fused, attention_mask)

    return (context_layer,)   # config.output_attentions = False


def _reference(hidden_states, attention_mask, params, num_heads):
    B, S, H = hidden_states.shape
    dh = H // num_heads
    q = hidden_states @ params["wq"] + params["bq"]
    k = hidden_states @ params["wk"] + params["bk"]
    v = hidden_states @ params["wv"] + params["bv"]

    def t(x):
        return x.reshape(B, S, num_heads, dh).transpose(0, 2, 1, 3)

    q, k, v = t(q), t(k), t(v)
    scores = jnp.einsum("bhqd,bhkd->bhqk", q, k) / math.sqrt(dh)
    scores = scores + attention_mask
    probs = jax.nn.softmax(scores, axis=-1)
    ctx = jnp.einsum("bhqk,bhkd->bhqd", probs, v)
    return ctx.transpose(0, 2, 1, 3).reshape(B, S, H)


if __name__ == "__main__":
    # Config: hidden_size=32, num_attention_heads=4, seq=8, batch=2
    B, S, H, NH = 2, 8, 32, 4

    key = jax.random.PRNGKey(0)
    ks = jax.random.split(key, 8)
    scale = 1.0 / math.sqrt(H)
    params = {
        "wq": jax.random.normal(ks[0], (H, H), jnp.float32) * scale,
        "wk": jax.random.normal(ks[1], (H, H), jnp.float32) * scale,
        "wv": jax.random.normal(ks[2], (H, H), jnp.float32) * scale,
        "bq": jax.random.normal(ks[3], (H,), jnp.float32) * 0.01,
        "bk": jax.random.normal(ks[4], (H,), jnp.float32) * 0.01,
        "bv": jax.random.normal(ks[5], (H,), jnp.float32) * 0.01,
    }
    hidden_states = jax.random.normal(ks[6], (B, S, H), jnp.float32)

    # Additive attention mask (BERT style): 0 for keep, -10000 for masked.
    keep = jnp.ones((B, S), jnp.float32).at[1, -2:].set(0.0)
    attention_mask = ((1.0 - keep) * -10000.0).reshape(B, 1, 1, S)

    (out,) = self_attention(hidden_states, attention_mask, params, NH)
    out = jax.block_until_ready(out)

    ref = _reference(hidden_states, attention_mask, params, NH)
    assert out.shape == (B, S, H)
    # Tolerance loosened slightly vs. exact f32: approx reciprocal (EUP vrcp)
    # in the deferred softmax normalization has ~1e-3-level relative error.
    assert jnp.allclose(out, ref, atol=2e-3, rtol=2e-3), "mismatch vs reference"

    print("KERNEL_OK")
</pallas_src>

<mosaic_0001>
module attributes {stable_mosaic.version = 11 : i64} {
  func.func @_attn_kernel(%arg0: i32, %arg1: i32, %arg2: memref<1x8x32xf32, #tpu.memory_space<vmem>>, %arg3: memref<1x32x96xf32, #tpu.memory_space<vmem>>, %arg4: memref<1x1x96xf32, #tpu.memory_space<vmem>>, %arg5: memref<1x1x1x8xf32, #tpu.memory_space<vmem>>, %arg6: memref<1x8x32xf32, #tpu.memory_space<vmem>>) attributes {dimension_semantics = [#tpu.dimension_semantics<parallel>, #tpu.dimension_semantics<parallel>], iteration_bounds = array<i64: 1, 2>, scalar_prefetch = 0 : i64, scratch_operands = 0 : i64, tpu.core_type = #tpu.core_type<tc>, window_params = [{transform_indices = @transform_0, window_bounds = array<i64: 1, 8, 32>}, {transform_indices = @transform_1, window_bounds = array<i64: 1, 32, 96>}, {transform_indices = @transform_2, window_bounds = array<i64: 1, 1, 96>}, {transform_indices = @transform_3, window_bounds = array<i64: 1, 1, 1, 8>}, {transform_indices = @transform_4, window_bounds = array<i64: 1, 8, 32>}]} {
    %c0 = arith.constant 0 : index
    %c0_0 = arith.constant 0 : index
    %c0_1 = arith.constant 0 : index
    %0 = vector.load %arg2[%c0, %c0_0, %c0_1] : memref<1x8x32xf32, #tpu.memory_space<vmem>>, vector<1x8x32xf32>
    %1 = vector.shape_cast %0 : vector<1x8x32xf32> to vector<8x32xf32>
    %c0_2 = arith.constant 0 : index
    %c0_3 = arith.constant 0 : index
    %c0_4 = arith.constant 0 : index
    %2 = vector.load %arg3[%c0_2, %c0_3, %c0_4] : memref<1x32x96xf32, #tpu.memory_space<vmem>>, vector<1x32x96xf32>
    %3 = vector.shape_cast %2 : vector<1x32x96xf32> to vector<32x96xf32>
    %c0_5 = arith.constant 0 : index
    %c0_6 = arith.constant 0 : index
    %c0_7 = arith.constant 0 : index
    %4 = vector.load %arg4[%c0_5, %c0_6, %c0_7] : memref<1x1x96xf32, #tpu.memory_space<vmem>>, vector<1x1x96xf32>
    %5 = vector.shape_cast %4 : vector<1x1x96xf32> to vector<1x96xf32>
    %cst = arith.constant dense<0.000000e+00> : vector<8x96xf32>
    %6 = tpu.matmul %1, %3, %cst {dimension_numbers = #tpu.dot_dimension_numbers<[1], [0], [0], [1], [0, 0, 1, 1], [], []>} : vector<8x32xf32>, vector<32x96xf32>, vector<8x96xf32> -> vector<8x96xf32>
    %7 = vector.broadcast %5 : vector<1x96xf32> to vector<8x96xf32>
    %8 = arith.addf %6, %7 : vector<8x96xf32>
    %9 = vector.extract_strided_slice %8 {offsets = [0, 0], sizes = [8, 32], strides = [1, 1]} : vector<8x96xf32> to vector<8x32xf32>
    %cst_8 = arith.constant 0.353553385 : f32
    %10 = vector.broadcast %cst_8 : f32 to vector<8x32xf32>
    %11 = arith.mulf %9, %10 : vector<8x32xf32>
    %12 = vector.extract_strided_slice %8 {offsets = [0, 32], sizes = [8, 32], strides = [1, 1]} : vector<8x96xf32> to vector<8x32xf32>
    %13 = vector.extract_strided_slice %8 {offsets = [0, 64], sizes = [8, 32], strides = [1, 1]} : vector<8x96xf32> to vector<8x32xf32>
    %c0_9 = arith.constant 0 : index
    %c0_10 = arith.constant 0 : index
    %c0_11 = arith.constant 0 : index
    %c0_12 = arith.constant 0 : index
    %14 = vector.load %arg5[%c0_9, %c0_10, %c0_11, %c0_12] : memref<1x1x1x8xf32, #tpu.memory_space<vmem>>, vector<1x1x1x8xf32>
    %15 = vector.shape_cast %14 : vector<1x1x1x8xf32> to vector<1x8xf32>
    %16 = vector.extract_strided_slice %11 {offsets = [0, 0], sizes = [8, 8], strides = [1, 1]} : vector<8x32xf32> to vector<8x8xf32>
    %17 = vector.extract_strided_slice %12 {offsets = [0, 0], sizes = [8, 8], strides = [1, 1]} : vector<8x32xf32> to vector<8x8xf32>
    %18 = vector.extract_strided_slice %13 {offsets = [0, 0], sizes = [8, 8], strides = [1, 1]} : vector<8x32xf32> to vector<8x8xf32>
    %cst_13 = arith.constant dense<0.000000e+00> : vector<8x8xf32>
    %19 = tpu.matmul %16, %17, %cst_13 {dimension_numbers = #tpu.dot_dimension_numbers<[1], [1], [0], [0], [0, 0, 1, 0], [], []>} : vector<8x8xf32>, vector<8x8xf32>, vector<8x8xf32> -> vector<8x8xf32>
    %20 = vector.broadcast %15 : vector<1x8xf32> to vector<8x8xf32>
    %21 = arith.addf %19, %20 : vector<8x8xf32>
    %cst_14 = arith.constant dense<0xFF800000> : vector<8xf32>
    %22 = vector.multi_reduction <maximumf>, %21, %cst_14 [1] : vector<8x8xf32> to vector<8xf32>
    %23 = vector.shape_cast %22 : vector<8xf32> to vector<8x1xf32>
    %24 = vector.broadcast %23 : vector<8x1xf32> to vector<8x8xf32>
    %25 = arith.subf %21, %24 : vector<8x8xf32>
    %26 = math.exp %25 : vector<8x8xf32>
    %cst_15 = arith.constant dense<0.000000e+00> : vector<8xf32>
    %27 = vector.multi_reduction <add>, %26, %cst_15 [1] : vector<8x8xf32> to vector<8xf32>
    %28 = vector.shape_cast %27 : vector<8xf32> to vector<8x1xf32>
    %cst_16 = arith.constant dense<0.000000e+00> : vector<8x8xf32>
    %29 = tpu.matmul %26, %18, %cst_16 {dimension_numbers = #tpu.dot_dimension_numbers<[1], [0], [0], [1], [0, 0, 1, 1], [], []>} : vector<8x8xf32>, vector<8x8xf32>, vector<8x8xf32> -> vector<8x8xf32>
    %30 = tpu.reciprocal %28 {approx = true} : vector<8x1xf32> -> vector<8x1xf32>
    %31 = vector.broadcast %30 : vector<8x1xf32> to vector<8x8xf32>
    %32 = arith.mulf %29, %31 : vector<8x8xf32>
    %c0_17 = arith.constant 0 : index
    %c0_18 = arith.constant 0 : index
    %c0_19 = arith.constant 0 : index
    %33 = vector.load %arg6[%c0_17, %c0_18, %c0_19] : memref<1x8x32xf32, #tpu.memory_space<vmem>>, vector<1x8x8xf32>
    %34 = vector.shape_cast %33 : vector<1x8x8xf32> to vector<8x8xf32>
    %35 = vector.shape_cast %32 : vector<8x8xf32> to vector<1x8x8xf32>
    tpu.vector_store %arg6[%c0_17, %c0_18, %c0_19], %35 {strides = array<i32>} : memref<1x8x32xf32, #tpu.memory_space<vmem>>, vector<1x8x8xf32>,
    %36 = vector.extract_strided_slice %11 {offsets = [0, 8], sizes = [8, 8], strides = [1, 1]} : vector<8x32xf32> to vector<8x8xf32>
    %37 = vector.extract_strided_slice %12 {offsets = [0, 8], sizes = [8, 8], strides = [1, 1]} : vector<8x32xf32> to vector<8x8xf32>
    %38 = vector.extract_strided_slice %13 {offsets = [0, 8], sizes = [8, 8], strides = [1, 1]} : vector<8x32xf32> to vector<8x8xf32>
    %cst_20 = arith.constant dense<0.000000e+00> : vector<8x8xf32>
    %39 = tpu.matmul %36, %37, %cst_20 {dimension_numbers = #tpu.dot_dimension_numbers<[1], [1], [0], [0], [0, 0, 1, 0], [], []>} : vector<8x8xf32>, vector<8x8xf32>, vector<8x8xf32> -> vector<8x8xf32>
    %40 = vector.broadcast %15 : vector<1x8xf32> to vector<8x8xf32>
    %41 = arith.addf %39, %40 : vector<8x8xf32>
    %cst_21 = arith.constant dense<0xFF800000> : vector<8xf32>
    %42 = vector.multi_reduction <maximumf>, %41, %cst_21 [1] : vector<8x8xf32> to vector<8xf32>
    %43 = vector.shape_cast %42 : vector<8xf32> to vector<8x1xf32>
    %44 = vector.broadcast %43 : vector<8x1xf32> to vector<8x8xf32>
    %45 = arith.subf %41, %44 : vector<8x8xf32>
    %46 = math.exp %45 : vector<8x8xf32>
    %cst_22 = arith.constant dense<0.000000e+00> : vector<8xf32>
    %47 = vector.multi_reduction <add>, %46, %cst_22 [1] : vector<8x8xf32> to vector<8xf32>
    %48 = vector.shape_cast %47 : vector<8xf32> to vector<8x1xf32>
    %cst_23 = arith.constant dense<0.000000e+00> : vector<8x8xf32>
    %49 = tpu.matmul %46, %38, %cst_23 {dimension_numbers = #tpu.dot_dimension_numbers<[1], [0], [0], [1], [0, 0, 1, 1], [], []>} : vector<8x8xf32>, vector<8x8xf32>, vector<8x8xf32> -> vector<8x8xf32>
    %50 = tpu.reciprocal %48 {approx = true} : vector<8x1xf32> -> vector<8x1xf32>
    %51 = vector.broadcast %50 : vector<8x1xf32> to vector<8x8xf32>
    %52 = arith.mulf %49, %51 : vector<8x8xf32>
    %c0_24 = arith.constant 0 : index
    %c0_25 = arith.constant 0 : index
    %c8 = arith.constant 8 : index
    %53 = vector.load %arg6[%c0_24, %c0_25, %c8] : memref<1x8x32xf32, #tpu.memory_space<vmem>>, vector<1x8x8xf32>
    %54 = vector.shape_cast %53 : vector<1x8x8xf32> to vector<8x8xf32>
    %55 = vector.shape_cast %52 : vector<8x8xf32> to vector<1x8x8xf32>
    tpu.vector_store %arg6[%c0_24, %c0_25, %c8], %55 {strides = array<i32>} : memref<1x8x32xf32, #tpu.memory_space<vmem>>, vector<1x8x8xf32>,
    %56 = vector.extract_strided_slice %11 {offsets = [0, 16], sizes = [8, 8], strides = [1, 1]} : vector<8x32xf32> to vector<8x8xf32>
    %57 = vector.extract_strided_slice %12 {offsets = [0, 16], sizes = [8, 8], strides = [1, 1]} : vector<8x32xf32> to vector<8x8xf32>
    %58 = vector.extract_strided_slice %13 {offsets = [0, 16], sizes = [8, 8], strides = [1, 1]} : vector<8x32xf32> to vector<8x8xf32>
    %cst_26 = arith.constant dense<0.000000e+00> : vector<8x8xf32>
    %59 = tpu.matmul %56, %57, %cst_26 {dimension_numbers = #tpu.dot_dimension_numbers<[1], [1], [0], [0], [0, 0, 1, 0], [], []>} : vector<8x8xf32>, vector<8x8xf32>, vector<8x8xf32> -> vector<8x8xf32>
    %60 = vector.broadcast %15 : vector<1x8xf32> to vector<8x8xf32>
    %61 = arith.addf %59, %60 : vector<8x8xf32>
    %cst_27 = arith.constant dense<0xFF800000> : vector<8xf32>
    %62 = vector.multi_reduction <maximumf>, %61, %cst_27 [1] : vector<8x8xf32> to vector<8xf32>
    %63 = vector.shape_cast %62 : vector<8xf32> to vector<8x1xf32>
    %64 = vector.broadcast %63 : vector<8x1xf32> to vector<8x8xf32>
    %65 = arith.subf %61, %64 : vector<8x8xf32>
    %66 = math.exp %65 : vector<8x8xf32>
    %cst_28 = arith.constant dense<0.000000e+00> : vector<8xf32>
    %67 = vector.multi_reduction <add>, %66, %cst_28 [1] : vector<8x8xf32> to vector<8xf32>
    %68 = vector.shape_cast %67 : vector<8xf32> to vector<8x1xf32>
    %cst_29 = arith.constant dense<0.000000e+00> : vector<8x8xf32>
    %69 = tpu.matmul %66, %58, %cst_29 {dimension_numbers = #tpu.dot_dimension_numbers<[1], [0], [0], [1], [0, 0, 1, 1], [], []>} : vector<8x8xf32>, vector<8x8xf32>, vector<8x8xf32> -> vector<8x8xf32>
    %70 = tpu.reciprocal %68 {approx = true} : vector<8x1xf32> -> vector<8x1xf32>
    %71 = vector.broadcast %70 : vector<8x1xf32> to vector<8x8xf32>
    %72 = arith.mulf %69, %71 : vector<8x8xf32>
    %c0_30 = arith.constant 0 : index
    %c0_31 = arith.constant 0 : index
    %c16 = arith.constant 16 : index
    %73 = vector.load %arg6[%c0_30, %c0_31, %c16] : memref<1x8x32xf32, #tpu.memory_space<vmem>>, vector<1x8x8xf32>
    %74 = vector.shape_cast %73 : vector<1x8x8xf32> to vector<8x8xf32>
    %75 = vector.shape_cast %72 : vector<8x8xf32> to vector<1x8x8xf32>
    tpu.vector_store %arg6[%c0_30, %c0_31, %c16], %75 {strides = array<i32>} : memref<1x8x32xf32, #tpu.memory_space<vmem>>, vector<1x8x8xf32>,
    %76 = vector.extract_strided_slice %11 {offsets = [0, 24], sizes = [8, 8], strides = [1, 1]} : vector<8x32xf32> to vector<8x8xf32>
    %77 = vector.extract_strided_slice %12 {offsets = [0, 24], sizes = [8, 8], strides = [1, 1]} : vector<8x32xf32> to vector<8x8xf32>
    %78 = vector.extract_strided_slice %13 {offsets = [0, 24], sizes = [8, 8], strides = [1, 1]} : vector<8x32xf32> to vector<8x8xf32>
    %cst_32 = arith.constant dense<0.000000e+00> : vector<8x8xf32>
    %79 = tpu.matmul %76, %77, %cst_32 {dimension_numbers = #tpu.dot_dimension_numbers<[1], [1], [0], [0], [0, 0, 1, 0], [], []>} : vector<8x8xf32>, vector<8x8xf32>, vector<8x8xf32> -> vector<8x8xf32>
    %80 = vector.broadcast %15 : vector<1x8xf32> to vector<8x8xf32>
    %81 = arith.addf %79, %80 : vector<8x8xf32>
    %cst_33 = arith.constant dense<0xFF800000> : vector<8xf32>
    %82 = vector.multi_reduction <maximumf>, %81, %cst_33 [1] : vector<8x8xf32> to vector<8xf32>
    %83 = vector.shape_cast %82 : vector<8xf32> to vector<8x1xf32>
    %84 = vector.broadcast %83 : vector<8x1xf32> to vector<8x8xf32>
    %85 = arith.subf %81, %84 : vector<8x8xf32>
    %86 = math.exp %85 : vector<8x8xf32>
    %cst_34 = arith.constant dense<0.000000e+00> : vector<8xf32>
    %87 = vector.multi_reduction <add>, %86, %cst_34 [1] : vector<8x8xf32> to vector<8xf32>
    %88 = vector.shape_cast %87 : vector<8xf32> to vector<8x1xf32>
    %cst_35 = arith.constant dense<0.000000e+00> : vector<8x8xf32>
    %89 = tpu.matmul %86, %78, %cst_35 {dimension_numbers = #tpu.dot_dimension_numbers<[1], [0], [0], [1], [0, 0, 1, 1], [], []>} : vector<8x8xf32>, vector<8x8xf32>, vector<8x8xf32> -> vector<8x8xf32>
    %90 = tpu.reciprocal %88 {approx = true} : vector<8x1xf32> -> vector<8x1xf32>
    %91 = vector.broadcast %90 : vector<8x1xf32> to vector<8x8xf32>
    %92 = arith.mulf %89, %91 : vector<8x8xf32>
    %c0_36 = arith.constant 0 : index
    %c0_37 = arith.constant 0 : index
    %c24 = arith.constant 24 : index
    %93 = vector.load %arg6[%c0_36, %c0_37, %c24] : memref<1x8x32xf32, #tpu.memory_space<vmem>>, vector<1x8x8xf32>
    %94 = vector.shape_cast %93 : vector<1x8x8xf32> to vector<8x8xf32>
    %95 = vector.shape_cast %92 : vector<8x8xf32> to vector<1x8x8xf32>
    tpu.vector_store %arg6[%c0_36, %c0_37, %c24], %95 {strides = array<i32>} : memref<1x8x32xf32, #tpu.memory_space<vmem>>, vector<1x8x8xf32>,
    return
  }
  func.func @transform_0(%arg0: i32, %arg1: i32) -> (i32, i32, i32) {
    %c0_i32 = arith.constant 0 : i32
    %c0_i32_0 = arith.constant 0 : i32
    %c0_i32_1 = arith.constant 0 : i32
    return %arg1, %c0_i32, %c0_i32_0 : i32, i32, i32
  }
  func.func @transform_1(%arg0: i32, %arg1: i32) -> (i32, i32, i32) {
    %c0_i32 = arith.constant 0 : i32
    %c0_i32_0 = arith.constant 0 : i32
    %c0_i32_1 = arith.constant 0 : i32
    return %arg0, %c0_i32, %c0_i32_0 : i32, i32, i32
  }
  func.func @transform_2(%arg0: i32, %arg1: i32) -> (i32, i32, i32) {
    %c0_i32 = arith.constant 0 : i32
    %c0_i32_0 = arith.constant 0 : i32
    %c0_i32_1 = arith.constant 0 : i32
    return %arg0, %c0_i32, %c0_i32_0 : i32, i32, i32
  }
  func.func @transform_3(%arg0: i32, %arg1: i32) -> (i32, i32, i32, i32) {
    %c0_i32 = arith.constant 0 : i32
    %c0_i32_0 = arith.constant 0 : i32
    %c0_i32_1 = arith.constant 0 : i32
    %c0_i32_2 = arith.constant 0 : i32
    return %arg1, %c0_i32, %c0_i32_0, %c0_i32_1 : i32, i32, i32, i32
  }
  func.func @transform_4(%arg0: i32, %arg1: i32) -> (i32, i32, i32) {
    %c0_i32 = arith.constant 0 : i32
    %c0_i32_0 = arith.constant 0 : i32
    return %arg1, %c0_i32, %arg0 : i32, i32, i32
  }
}

</mosaic_0001>

<bundles_post_ra>
// kernel: tpu_custom_call.1
= control target key start
LH: loop header
LB: loop body
LE: loop exit
PB: predicated region body
PF: predicated region fallthrough
CT: control target
= control target key end

     0   :  { %9 = vsyncpa [#allocation3], 0  ;;  %s1880_s0 = inlined_call_operand.hbm [shape: f32[2,8,32], index: 0, kind: input, shape index: {}]   ;;  %s1881_s1 = inlined_call_operand.hbm [shape: f32[1,32,96], index: 1, kind: input, shape index: {}]   ;;  %s1882_s2 = inlined_call_operand.vmem [shape: f32[1,1,96], index: 2, kind: input, shape index: {}]   ;;  %s1883_s3 = inlined_call_operand.vmem [shape: f32[2,1,1,8], index: 3, kind: input, shape index: {}]   ;;  %s1884_s4 = inlined_call_operand.hbm [shape: f32[2,8,32], index: 4, kind: output, shape index: {}]  }
   0x1   :  { %11 = vsyncpa [#allocation3 + $0x1], 0 }
   0x2   :  { %12 = vsyncpa [#allocation6], 0 }
   0x3   :  { %13 = vsyncpa [#allocation4], 0 }
   0x4   :  { %15 = vsyncpa [#allocation4 + $0x1], 0  ;;  %s1589_s15 = smov 0   ;;  %s1591_s16 = smov 0  }
   0x5   :  { %s1593_s17 = smov 0   ;;  %s1595_s18 = smov 0  }
   0x6   :  { %s1597_s19 = smov 0   ;;  %s1599_s20 = smov 0  }
   0x7 LB: > { %s1179_s21 = sadd.s32 4294967295, %s1540_s20   ;;  %s1180_s22 = sadd.s32 4294967294, %s1540_s20   ;;  %s1540_s20 = sphi %s1599_s20, %s21_s20   ;;  %s1536_s19 = sphi %s1597_s19, %s1908_s19   ;;  %s1532_s18 = sphi %s1595_s18, %s1907_s18   ;;  %s1528_s17 = sphi %s1593_s17, %s1906_s17   ;;  %s1524_s16 = sphi %s1591_s16, %s1905_s16   ;;  %s1520_s15 = sphi %s1589_s15, %s1904_s15  }
   0x8   : > { %p53_p0 = scmp.ne.s32.totalorder %s1524_s16, %s1520_s15  ;;  %p1623_p1 = scmp.eq.s32.totalorder %s1179_s21, 0 }
   0x9   : > { %p1627_p2 = scmp.eq.s32.totalorder %s1179_s21, 1  ;;  %p163_p3 = scmp.eq.s32.totalorder %s1180_s22, 1 }
   0xa   : > { %s1889_s23 = scalar_select %p1623_p1, 1, 0 }
   0xb   : > { %s1890_s24 = scalar_select %p1627_p2, 1, 0 }
   0xc   : > { %p1633_p4 = por %p1623_p1, %p53_p0  ;;  %p1181_p5 = scmp.ge.s32.totalorder %s1540_s20, 1 }
   0xd   : > { %p1638_p6 = por %p163_p3, %p53_p0  ;;  %p170_p7 = scmp.lt.s32.totalorder %s1540_s20, 3 }
   0xe   : > { %s1891_s25 = scalar_select %p1633_p4, 1, 0 }
   0xf   : > { %s1892_s26 = scalar_select %p1638_p6, 1, 0 }
  0x10   : > { %p1643_p8 = pnand %p1181_p5, %p170_p7  ;;  %s1542_s28 = smov [#allocation5]  }
  0x11   : > { %s185_s29 = sshll.u32 %s1542_s28, 4  ;;  %s30_s5 = sadd.s32 1, %s1536_s19  ;;  %s186_s29 = int_to_ptr.vmem [resolvable:$true] %s185_s29 }
  0x12   : > { %s1893_s27 = scalar_select %p1643_p8, 1, 0 }
  0x13   : > { %p1296_p9 = pneg %p1643_p8  ;;  %s1396_s8 = scalar_lea.hbm %s1881_s1, 512 }
  0x14   : > { %p1397_p12 = scmp.ne.s32.totalorder %s1881_s1, %s1396_s8  ;;  %p1403_p5 = scmp.lt.u32.totalorder %s1396_s8, %s1881_s1 }
  0x15   : > { %p1652_p11 = pnand %p1296_p9, %p1623_p1 }
  0x17   : > { %p1398_p13 = pneg %p1652_p11 }
  0x19   : > { %p1399_p0 = pnand %p1398_p13, %p1397_p12 }
  0x1b   : > { %p1400_p3 = pneg %p1399_p0 }
  0x1d   : > { %p1405_p7 = pnand %p1403_p5, %p1400_p3 }
  0x1f   : > { %1408 = shalt.err (!%p1405_p7)
}
  0x20   : > { %s1409_s13 = scalar_lea.vmem %s186_s29, 512  ;;  %p1417_p1 = scmp.lt.s32.totalorder %s186_s29, %s186_s29 }
  0x21   : > { %p1410_p9 = scmp.ne.s32.totalorder %s186_s29, %s1409_s13  ;;  %p1418_p4 = scmp.lt.s32.totalorder %s1409_s13, %s1409_s13 }
  0x23   : > { %p1412_p10 = pnand %p1410_p9, %p1398_p13  ;;  %p1419_p8 = por %p1418_p4, %p1417_p1 }
  0x25   : > { %p1413_p6 = pneg %p1412_p10 }
  0x27   : > { %p1420_p2 = pnand %p1419_p8, %p1413_p6 }
  0x29   : > { %1423 = shalt.err (!%p1420_p2)
}
  0x2a   : > { %s1543_s14 = smov 128   ;;  %s1544_s21 = smov 8  }
  0x2b   : > { %1299 = dma.hbm_to_vmem [thread:$0]  (!%p1652_p11), %s1881_s1, 512, %s186_s29, [#allocation6], %s1543_s14, %s1543_s14, %s1544_s21  }
  0x2c   : > { %p31_p1 = scmp.ge.s32.totalorder %s30_s5, 2  ;;  %s40_s6 = sadd.s32 1, %s1528_s17 }
  0x2d   : > { %p47_p2 = scmp.ne.s32.totalorder %s1528_s17, %s1524_s16  ;;  %p48_p4 = scmp.eq.s32.totalorder %s1540_s20, 0 }
  0x2e   : > { %s1910_s5 = smov (%p31_p1, %s30_s5), 0  ;;  %p1896_p8 = scmp.ne.s32.totalorder %s1890_s24, 0 }
  0x2f   : > { %p1679_p6 = por %p48_p4, %p47_p2  ;;  %s37_s30 = ssub.s32 %s1536_s19, %s1910_s5 }
  0x30   : > { %p1685_p10 = por %p1896_p8, %p47_p2  ;;  %p1309_p12 = scmp.lt.s32.totalorder %s1540_s20, 2 }
  0x31   : > { %p38_p11 = scmp.eq.s32.totalorder %s37_s30, 0  ;;  %s205_s29 = sand.u32 1, %s1528_s17  }
  0x32   : > { %s1185_s9 = sshll.u32 %s205_s29, 3  ;;  %s1186_s11 = sshll.u32 %s1536_s19, 7 }
  0x33   : > { %s1694_s10 = scalar_select %p38_p11, %s1528_s17, %s40_s6  }
  0x34   : > { %s1700_s14 = scalar_lea.hbm %s1880_s0, %s1186_s11  ;;  %s209_s24 = scalar_lea.vmem [#allocation2], %s1185_s9 }
  0x35   : > { %s216_s21 = sshll.u32 %s209_s24, 4  ;;  %p1706_p13 = pnand %p1309_p12, %p1679_p6  ;;  %s1702_s21 = int_to_ptr.vmem [resolvable:$true] %s216_s21 }
  0x36   : > { %s206_s28 = scalar_lea.sflag [#allocation3], %s205_s29  ;;  %s1424_s6 = scalar_lea.hbm %s1700_s14, 128 }
  0x37   : > { %p1425_p0 = scmp.ne.s32.totalorder %s1700_s14, %s1424_s6  ;;  %p1426_p3 = pneg %p1706_p13 }
  0x38   : > { %s1429_s11 = scalar_lea.hbm %s1880_s0, 256  ;;  %p1430_p9 = scmp.lt.u32.totalorder %s1700_s14, %s1880_s0 }
  0x39   : > { %p1427_p5 = pnand %p1426_p3, %p1425_p0  ;;  %p1431_p1 = scmp.lt.u32.totalorder %s1429_s11, %s1424_s6 }
  0x3a   : > { %p1433_p4 = scmp.lt.u32.totalorder %s1424_s6, %s1700_s14 }
  0x3b   : > { %p1428_p7 = pneg %p1427_p5  ;;  %p1432_p2 = por %p1431_p1, %p1430_p9 }
  0x3d   : > { %p1434_p6 = por %p1433_p4, %p1432_p2 }
  0x3f   : > { %p1435_p8 = pnand %p1434_p6, %p1428_p7 }
  0x41   : > { %1438 = shalt.err (!%p1435_p8)
}
  0x42   : > { %s1439_s29 = scalar_lea.vmem %s1702_s21, 128  ;;  %s1545_s13 = smov [#allocation2]  }
  0x43   : > { %p1440_p12 = scmp.ne.s32.totalorder %s1702_s21, %s1439_s29  ;;  %s1444_s24 = sshll.u32 %s1545_s13, 4  ;;  %s1445_s24 = int_to_ptr.vmem [resolvable:$false] %s1444_s24 }
  0x44   : > { %s1446_s30 = scalar_lea.vmem %s1445_s24, 256  ;;  %p1447_p5 = scmp.lt.s32.totalorder %s1702_s21, %s1445_s24 }
  0x45   : > { %p1442_p11 = pnand %p1440_p12, %p1426_p3  ;;  %p1448_p9 = scmp.lt.s32.totalorder %s1446_s30, %s1439_s29 }
  0x47   : > { %p1443_p0 = pneg %p1442_p11  ;;  %p1449_p1 = por %p1448_p9, %p1447_p5 }
  0x49   : > { %p1450_p2 = pnand %p1449_p1, %p1443_p0 }
  0x4b   : > { %1453 = shalt.err (!%p1450_p2)
}
  0x4c   : > { %1303 = dma.hbm_to_vmem [thread:$0]  (!%p1706_p13), %s1700_s14, 128, %s1702_s21, %s206_s28  }
  0x4d   : > { %p1899_p7 = scmp.ne.s32.totalorder %s1893_s27, 0 }
  0x4e   : > { %s1738_s6 = sand.u32 (!%p1899_p7), 1, %s1524_s16   ;;  %p1900_p3 = scmp.ne.s32.totalorder (!%p1899_p7), %s1891_s25, 0 }
  0x4f   : > { %231 = sbr.rel (%p1899_p7) target bundleno = 1201 (0x4b1), region = 36  ;;  %s1188_s9 = sshll.u32 (!%p1899_p7), %s1738_s6, 3 }
  0x50   : > { %s234_s11 = scalar_lea.sflag (!%p1899_p7), [#allocation3], %s1738_s6  ;;  %s237_s7 = scalar_lea.vmem (!%p1899_p7), [#allocation2], %s1188_s9 }
  0x56   : > { %1507 = dma.done.wait (%p1900_p3), %s234_s11, 128  }
  0x57   : > { %1509 = vsyncadd (%p1900_p3), %s234_s11, 4294967168  ;;  %p1901_p13 = scmp.ne.s32.totalorder %s1889_s23, 0 }
  0x59   : > { %1511 = dma.done.wait (%p1901_p13), [#allocation6], 512  }
  0x5a   : > { %1513 = vsyncadd (%p1901_p13), [#allocation6], 4294966784  ;;  %v1546_v0 = vmov 0.0|0.0   ;;  %vm1547_vm0 = vmmov 0   ;;  %v1548_v1 = vmov 0.0   ;;  %v279_v2 = vld [vmem:[#allocation5] sm:$0xff] }
  0x5b   : > { %1282 = vmatprep.subr.bf16.mxu0 %v1546_v0  ;;  %1239 = vmatprep.mubr.msk.f32.mxu0 %vm1547_vm0, %v1548_v1  ;;  %v280_v3 = vld [vmem:[#allocation5 + $0x8] sm:$0xff]  ;;  %v281_v4 = vld [vmem:[#allocation5 + $0x10] sm:$0xff]  ;;  %v282_v6 = vld [vmem:[#allocation5 + $0x18] sm:$0xff]  ;;  %vm290_vm1 = vcmask 261120   ;;  %s1549_s27 = smov 96   ;;  %s1550_s14 = smov 120  }
  0x5c   : > { %1242 = vmatprep.subr.mxu1 %v1548_v1  ;;  %1244 = vmatprep.mubr.msk.f32.mxu1 %vm1547_vm0, %v1548_v1  ;;  %v1283_v5 = vpack.c.bf16 %v280_v3, %v279_v2  ;;  %v1286_v7 = vpack.c.bf16 %v282_v6, %v281_v4  ;;  %v278_v8 = vld [vmem:[%s237_s7] sm:$0xff]  ;;  %s1551_s21 = smov 88   ;;  %s1552_s22 = smov 80   ;;  %vm375_vm2 = vcmask 64512   ;;  %vm708_vm3 = vcmask 130112  }
  0x5d   : > { %v1191_v9 = vld [vmem:[%s1882_s2] ss:$0 sm:$0xff]  ;;  %s1553_s28 = smov 112   ;;  %s1554_s12 = smov 72   ;;  %vm879_vm4 = vcmask 195712   ;;  %vm1050_vm5 = vcmask 261312  }
  0x5e   : > { %1284 = vmatpush3.bf16.msra.mxu0 %v1283_v5  ;;  %s1555_s29 = smov 104   ;;  %p275_p4 = scmp.lt.s32.totalorder %s1532_s18, 1 }
  0x5f   : > { %1285 = vmatprep.subr.bf16.mxu0 %v1546_v0  ;;  %s1556_s7 = smov 56   ;;  %s1557_s23 = smov 64  }
  0x60   : > { %s276_s13 = scalar_select %p275_p4, %s1532_s18, 1 }
  0x61   : > { %s1558_s25 = smov 40   ;;  %s1053_s30 = scalar_lea.sflag [#allocation4], %s1738_s6 }
  0x62   : > { %1287 = vmatpush3.bf16.msra.mxu0 %v1286_v7  ;;  %s277_s11 = scalar_lea.vmem %s1883_s3, %s276_s13 }
  0x63   : > { %1252 = vmatprep.subr.mxu0 %v1548_v1  ;;  %v1193_v21 = vld [vmem:[%s277_s11] ss:$0 sm:$0xff] }
  0x65   : > { %1240 = vmatmul.mubr.msk.f32.vlgmr.msra.gmra.mrb[0].mxu0 %vm290_vm1, %v278_v8 }
  0x66   : > { %1254 = vmatprep.mubr.msk.f32.mxu0 %vm1547_vm0, %v1548_v1 }
 0x138   : > { %v360_v10 = vpop.f32.mrb[0].mxu0 }
 0x139   : > { %v1763_v11 = vadd.f32 %v1191_v9, %v360_v10  ;;  %v1241_v12 = vpop.f32.mrb[1].mxu0 }
 0x13b   : > { %373 = vrot.lane.b32.xlu0 %v1763_v11, %s1549_s27  ;;  %v364_v13 = vmul.f32 0.35355338, %v1763_v11  ;;  %s1559_s27 = smov 48  }
 0x13d   : > { %539 = vrot.lane.b32.xlu1 %v364_v13, %s1550_s14  ;;  %s1819_s14 = scalar_lea.vmem [#allocation7], %s1188_s9  ;;  %s1561_s9 = smov 16  }
 0x13f   : > { %541 = vrot.lane.b32.xlu0 %v1763_v11, %s1551_s21  ;;  %s1560_s21 = smov 8  }
 0x141   : > { %712 = vrot.lane.b32.xlu1 %v1763_v11, %s1552_s22  ;;  %s1562_s22 = smov 24  }
 0x143   : > { %710 = vrot.lane.b32.xlu0 %v364_v13, %s1553_s28  ;;  %s1207_s28 = sshll.u32 %s1532_s18, 7  ;;  %s1563_s18 = smov [#allocation7]  }
 0x144   : > { %s1830_s24 = scalar_lea.hbm %s1884_s4, %s1207_s28 }
 0x145   : > { %883 = vrot.lane.b32.xlu1 %v1763_v11, %s1554_s12  ;;  %s1067_s12 = sshll.u32 %s1819_s14, 4  ;;  %s1832_s12 = int_to_ptr.vmem [resolvable:$true] %s1067_s12 }
 0x146   : > { %s1454_s11 = scalar_lea.vmem %s1832_s12, 128 }
 0x147   : > { %881 = vrot.lane.b32.xlu0 %v364_v13, %s1555_s29  ;;  %p1455_p6 = scmp.ne.s32.totalorder %s1832_s12, %s1454_s11 }
 0x149   : > { %p1456_p8 = pnand %p1455_p6, %p1685_p10 }
 0x14b   : > { %p1457_p12 = pneg %p1456_p8 }
 0x1ad   : > { %v374_v14 = vpop.permute.xlu0 %373 }
 0x1ae   : > { %1243 = vmatpush3.xpose.msk.msra.mxu1 %vm375_vm2, %v374_v14 }
 0x1af   : > { %v540_v15 = vpop.permute.xlu1 %539  ;;  %1247 = vmatprep.subr.mxu1 %v1548_v1 }
 0x1b1   : > { %v542_v16 = vpop.permute.xlu0 %541  ;;  %1245 = vmatmul.mubr.msk.f32.vlgmr.msra.gmra.mrb[0].mxu1 %vm375_vm2, %v364_v13 }
 0x1b2   : > { %1253 = vmatpush3.xpose.msk.msra.mxu0 %vm375_vm2, %v542_v16  ;;  %1249 = vmatprep.mubr.msk.f32.mxu1 %vm1547_vm0, %v1548_v1 }
 0x1b3   : > { %v713_v17 = vpop.permute.xlu1 %712  ;;  %1262 = vmatprep.subr.mxu0 %v1548_v1 }
 0x1b5   : > { %1255 = vmatmul.mubr.msk.f32.vlgmr.msra.gmra.mrb[2].mxu0 %vm375_vm2, %v540_v15  ;;  %v711_v18 = vpop.permute.xlu0 %710 }
 0x1b6   : > { %1263 = vmatpush3.xpose.msk.msra.mxu0 %vm375_vm2, %v713_v17  ;;  %1264 = vmatprep.mubr.msk.f32.mxu0 %vm1547_vm0, %v1548_v1 }
 0x1b7   : > { %1272 = vmatprep.subr.mxu0 %v1548_v1  ;;  %v884_v19 = vpop.permute.xlu1 %883 }
 0x1b9   : > { %1265 = vmatmul.mubr.msk.f32.vlgmr.msra.gmra.mrb[4].mxu0 %vm375_vm2, %v711_v18  ;;  %v882_v20 = vpop.permute.xlu0 %881 }
 0x1ba   : > { %1273 = vmatpush3.xpose.msk.msra.mxu0 %vm375_vm2, %v884_v19  ;;  %1274 = vmatprep.mubr.msk.f32.mxu0 %vm1547_vm0, %v1548_v1 }
 0x1bd   : > { %1275 = vmatmul.mubr.msk.f32.vlgmr.msra.gmra.mrb[6].mxu0 %vm375_vm2, %v882_v20 }
 0x284   : > { %v447_v22 = vpop.f32.mrb[0].mxu1 }
 0x285   : > { %v448_v23 = vadd.f32 %v1193_v21, %v447_v22  ;;  %v1246_v24 = vpop.f32.mrb[1].mxu1 }
 0x287   : > { %v451_v25 = vsel %vm375_vm2, %v448_v23, -inf }
 0x288   : > { %452 = vmax.xlane.f32.xlu1 %v451_v25  ;;  %v613_v26 = vpop.f32.mrb[2].mxu0 }
 0x289   : > { %v614_v27 = vadd.f32 %v1193_v21, %v613_v26  ;;  %v1256_v28 = vpop.f32.mrb[3].mxu0 }
 0x28b   : > { %v617_v29 = vsel %vm375_vm2, %v614_v27, -inf }
 0x28c   : > { %618 = vmax.xlane.f32.xlu0 %v617_v29  ;;  %v784_v30 = vpop.f32.mrb[4].mxu0 }
 0x28d   : > { %v785_v31 = vadd.f32 %v1193_v21, %v784_v30  ;;  %v1266_v32 = vpop.f32.mrb[5].mxu0 }
 0x28f   : > { %v788_v33 = vsel %vm375_vm2, %v785_v31, -inf }
 0x290   : > { %789 = vmax.xlane.f32.xlu0 %v788_v33  ;;  %v955_v34 = vpop.f32.mrb[6].mxu0 }
 0x291   : > { %v1276_v35 = vpop.f32.mrb[7].mxu0  ;;  %v956_v36 = vadd.f32 %v1193_v21, %v955_v34 }
 0x293   : > { %v959_v37 = vsel %vm375_vm2, %v956_v36, -inf }
 0x299   : > { %626 = vrot.lane.b32.xlu1 %v1763_v11, %s1556_s7  ;;  %s1458_s7 = sshll.u32 %s1563_s18, 4  ;;  %s1459_s7 = int_to_ptr.vmem [resolvable:$false] %s1458_s7 }
 0x29a   : > { %p1461_p11 = scmp.lt.s32.totalorder %s1832_s12, %s1459_s7 }
 0x2a6   : > { %460 = vrot.lane.b32.xlu0 %v1763_v11, %s1557_s23  ;;  %s1460_s23 = scalar_lea.vmem %s1459_s7, 256 }
 0x2a7   : > { %p1462_p0 = scmp.lt.s32.totalorder %s1460_s23, %s1454_s11 }
 0x2a9   : > { %p1463_p5 = por %p1462_p0, %p1461_p11 }
 0x2aa   : > { %968 = vrot.lane.b32.xlu0 %v1763_v11, %s1558_s25 }
 0x2ab   : > { %p1464_p9 = pnand %p1463_p5, %p1457_p12 }
 0x2bd   : > { %960 = vmax.xlane.f32.xlu1 %v959_v37 }
 0x2ce   : > { %797 = vrot.lane.b32.xlu1 %v1763_v11, %s1559_s27 }
 0x315   : > { %v453_v38 = vpop.xlane.xlu1 %452 }
 0x316   : > { %v454_v39 = vsub.f32 %v448_v23, %v453_v38 }
 0x318   : > { %v455_v40 = vmul.f32 1.442695, %v454_v39 }
 0x319   : > { %v619_v41 = vpop.xlane.xlu0 %618  ;;  %v627_v49 = vpop.permute.xlu1 %626 }
 0x31a   : > { %1380 = vpow2.f32 %v455_v40  ;;  %v620_v42 = vsub.f32 %v614_v27, %v619_v41 }
 0x31c   : > { %v621_v43 = vmul.f32 1.442695, %v620_v42 }
 0x31d   : > { %v790_v44 = vpop.xlane.xlu0 %789 }
 0x31e   : > { %1382 = vpow2.f32 %v621_v43  ;;  %v791_v45 = vsub.f32 %v785_v31, %v790_v44 }
 0x320   : > { %v792_v46 = vmul.f32 1.442695, %v791_v45 }
 0x321   : > { %v461_v47 = vpop.permute.xlu0 %460 }
 0x322   : > { %1384 = vpow2.f32 %v792_v46  ;;  %1248 = vmatpush3.msra.mxu1 %v461_v47 }
 0x323   : > { %1257 = vmatprep.subr.mxu1 %v1548_v1 }
 0x324   : > { %v1381_v48 = vpop.eup %1380 }
 0x325   : > { %1250 = vmatmul.mubr.msk.f32.vlgmr.msra.gmra.mrb[2].mxu1 %vm375_vm2, %v1381_v48  ;;  %v457_v54 = vsel %vm375_vm2, %v1381_v48, 0.0  ;;  %v969_v59 = vpop.permute.xlu0 %968 }
 0x326   : > { %1258 = vmatpush3.msra.mxu1 %v627_v49  ;;  %1259 = vmatprep.mubr.msk.f32.mxu1 %vm1547_vm0, %v1548_v1 }
 0x327   : > { %1267 = vmatprep.subr.mxu1 %v1548_v1 }
 0x328   : > { %v1383_v50 = vpop.eup %1382 }
 0x329   : > { %1260 = vmatmul.mubr.msk.f32.vlgmr.msra.gmra.mrb[4].mxu1 %vm375_vm2, %v1383_v50  ;;  %v623_v51 = vsel %vm375_vm2, %v1383_v50, 0.0 }
 0x32a   : > { %624 = vadd.xlane.f32.xlu1 %v623_v51  ;;  %1269 = vmatprep.mubr.msk.f32.mxu1 %vm1547_vm0, %v1548_v1 }
 0x32c   : > { %v1385_v52 = vpop.eup %1384 }
 0x32d   : > { %v794_v53 = vsel %vm375_vm2, %v1385_v52, 0.0 }
 0x32e   : > { %795 = vadd.xlane.f32.xlu0 %v794_v53  ;;  %458 = vadd.xlane.f32.xlu1 %v457_v54 }
 0x34a   : > { %v961_v55 = vpop.xlane.xlu1 %960 }
 0x34b   : > { %v962_v56 = vsub.f32 %v956_v36, %v961_v55 }
 0x34d   : > { %v963_v57 = vmul.f32 1.442695, %v962_v56 }
 0x34e   : > { %v798_v58 = vpop.permute.xlu1 %797 }
 0x34f   : > { %1386 = vpow2.f32 %v963_v57  ;;  %1268 = vmatpush3.msra.mxu1 %v798_v58 }
 0x350   : > { %1270 = vmatmul.mubr.msk.f32.vlgmr.msra.gmra.mrb[6].mxu1 %vm375_vm2, %v1385_v52  ;;  %1277 = vmatprep.subr.mxu1 %v1548_v1 }
 0x351   : > { %1278 = vmatpush3.msra.mxu1 %v969_v59  ;;  %1279 = vmatprep.mubr.msk.f32.mxu1 %vm1547_vm0, %v1548_v1 }
 0x359   : > { %v1387_v60 = vpop.eup %1386 }
 0x35a   : > { %1280 = vmatmul.mubr.msk.f32.vlgmr.msra.gmra.mrb[8].mxu1 %vm375_vm2, %v1387_v60  ;;  %v965_v61 = vsel %vm375_vm2, %v1387_v60, 0.0 }
 0x35b   : > { %966 = vadd.xlane.f32.xlu0 %v965_v61 }
 0x3b7   : > { %v625_v62 = vpop.xlane.xlu1 %624 }
 0x3bb   : > { %v459_v63 = vpop.xlane.xlu1 %458  ;;  %v796_v8 = vpop.xlane.xlu0 %795 }
 0x3bc   : > { %1388 = vrcp.f32 %v459_v63 }
 0x3bd   : > { %1390 = vrcp.f32 %v625_v62 }
 0x3be   : > { %1392 = vrcp.f32 %v796_v8 }
 0x3c6   : > { %v1389_v0 = vpop.eup %1388 }
 0x3c7   : > { %v1391_v1 = vpop.eup %1390 }
 0x3c8   : > { %v1393_v10 = vpop.eup %1392 }
 0x3e8   : > { %v967_v9 = vpop.xlane.xlu0 %966 }
 0x3e9   : > { %1394 = vrcp.f32 %v967_v9 }
 0x3f3   : > { %v1395_v14 = vpop.eup %1394 }
 0x3f8   : > { %v532_v2 = vpop.f32.mrb[2].mxu1 }
 0x3f9   : > { %v537_v3 = vmul.f32 %v1389_v0, %v532_v2  ;;  %v1251_v4 = vpop.f32.mrb[3].mxu1 }
 0x3fb   : > { %538 = vst.msk [vmem:[%s1819_s14] sm:$0xff] %vm375_vm2, %v537_v3 }
 0x3fc   : > { %v698_v5 = vpop.f32.mrb[4].mxu1 }
 0x3fd   : > { %v703_v6 = vmul.f32 %v1391_v1, %v698_v5  ;;  %v1261_v7 = vpop.f32.mrb[5].mxu1 }
 0x3ff   : > { %705 = vrot.lane.b32.xlu0 %v703_v6, %s1560_s21 }
 0x423   : > { %v869_v11 = vpop.f32.mrb[6].mxu1 }
 0x424   : > { %v874_v12 = vmul.f32 %v1393_v10, %v869_v11  ;;  %v1271_v13 = vpop.f32.mrb[7].mxu1 }
 0x426   : > { %876 = vrot.lane.b32.xlu1 %v874_v12, %s1561_s9 }
 0x42d   : > { %v1040_v15 = vpop.f32.mrb[8].mxu1 }
 0x42e   : > { %v1045_v16 = vmul.f32 %v1395_v14, %v1040_v15  ;;  %v1281_v17 = vpop.f32.mrb[9].mxu1 }
 0x430   : > { %1047 = vrot.lane.b32.xlu1 %v1045_v16, %s1562_s22 }
 0x471   : > { %v706_v18 = vpop.permute.xlu0 %705 }
 0x472   : > { %709 = vst.msk [vmem:[%s1819_s14] sm:$0xff] %vm708_vm3, %v706_v18 }
 0x498   : > { %v877_v19 = vpop.permute.xlu1 %876 }
 0x499   : > { %880 = vst.msk [vmem:[%s1819_s14] sm:$0xff] %vm879_vm4, %v877_v19 }
 0x4a2   : > { %v1048_v20 = vpop.permute.xlu1 %1047 }
 0x4a3   : > { %1051 = vst.msk [vmem:[%s1819_s14] sm:$0xff] %vm1050_vm5, %v1048_v20 }
 0x4a4   : > { %1467 = shalt.err (!%p1464_p9)
}
 0x4a5   : > { %s1468_s6 = scalar_lea.hbm %s1830_s24, 128  ;;  %s1472_s14 = scalar_lea.hbm %s1884_s4, 256 }
 0x4a6   : > { %p1469_p1 = scmp.ne.s32.totalorder %s1830_s24, %s1468_s6  ;;  %p1473_p3 = scmp.lt.u32.totalorder %s1830_s24, %s1884_s4 }
 0x4a7   : > { %p1474_p13 = scmp.lt.u32.totalorder %s1472_s14, %s1468_s6  ;;  %p1476_p6 = scmp.lt.u32.totalorder %s1468_s6, %s1830_s24 }
 0x4a8   : > { %p1470_p2 = pnand %p1469_p1, %p1685_p10 }
 0x4a9   : > { %p1475_p4 = por %p1474_p13, %p1473_p3 }
 0x4aa   : > { %p1471_p7 = pneg %p1470_p2 }
 0x4ab   : > { %p1477_p8 = por %p1476_p6, %p1475_p4 }
 0x4ad   : > { %p1478_p12 = pnand %p1477_p8, %p1471_p7 }
 0x4af   : > { %1481 = shalt.err (!%p1478_p12)
}
 0x4b0   : > { %1294 = dma.vmem_to_hbm [thread:$0]  (%p1685_p10), %s1832_s12, 128, %s1830_s24, %s1053_s30  }
 0x4b1 PF: > { %s1079_s22 = sand.u32 1, %s1520_s15   ;;  %p1902_p11 = scmp.ne.s32.totalorder %s1892_s26, 0 }
 0x4b2   : > { %p1903_p0 = scmp.ge.s32.totalorder %s1540_s20, 2  ;;  %s1080_s28 = scalar_lea.sflag [#allocation4], %s1079_s22 }
 0x4b4   : > { %p1305_p5 = pnand %p1903_p0, %p1902_p11 }
 0x4b6   : > { %1515 = dma.done.wait (!%p1305_p5), %s1080_s28, 128  }
 0x4b7   : > { %1517 = vsyncadd (!%p1305_p5), %s1080_s28, 4294967168  ;;  %s21_s20 = sadd.s32 1, %s1540_s20   ;;  %s1904_s15 = smov %s1524_s16 }
 0x4b8   : > { %p18_p9 = scmp.ge.s32.totalorder %s21_s20, 4   ;;  %s1905_s16 = smov %s1528_s17 }
 0x4b9   : > { %s1906_s17 = smov %s1694_s10  ;;  %s1907_s18 = smov %s1536_s19 }
 0x4ba   : > { %s1908_s19 = smov %s1910_s5  ;;  %20 = sbr.rel (!%p18_p9) target bundleno = 7 (0x7), region = 92 }
 0x4c1   :  { %1085 = vsyncpa [#allocation3], 1 }
 0x4c2   :  { %1087 = vsyncpa [#allocation3 + $0x1], 1 }
 0x4c3   :  { %1088 = vsyncpa [#allocation6], 1 }
 0x4c4   :  { %1089 = vsyncpa [#allocation4], 1 }
 0x4c5   :  { %1091 = vsyncpa [#allocation4 + $0x1], 1 }

</bundles_post_ra>
